<compile_context>
chip_gen: v5e
topology: v5e:2x2
jax: 0.10.0
libtpu: 0.0.40
codegen_flags: <defaults>
</compile_context>

<pallas_src>
import functools

import jax
import jax.numpy as jnp
from jax import lax
from jax.experimental import pallas as pl
from jax.experimental.pallas import tpu as pltpu

_LANES = 128
_SUBLANES = 8
_MAX_BLOCK_ROWS = 1024          # 1024 rows * 128 lanes = 131072 boxes / step
_SINGLE_BLOCK_MAX_ROWS = 64     # <= 8192 boxes -> single block, in-kernel finish


def _round_up(x, m):
    return ((x + m - 1) // m) * m


def _compute_loss(p_ref, t_ref, loss_type):
    """Per-box loss on full (block_rows, 128) vreg-dense planes (pure VPU)."""
    pcx, pcy, pw, ph = p_ref[0], p_ref[1], p_ref[2], p_ref[3]
    tcx, tcy, tw, th = t_ref[0], t_ref[1], t_ref[2], t_ref[3]

    phw, phh = pw * 0.5, ph * 0.5
    thw, thh = tw * 0.5, th * 0.5

    # Corner planes computed once; reused by the intersection and (for giou)
    # the enclosing box, so the giou branch adds only min/max/mul/sub ops.
    p_x1, p_x2 = pcx - phw, pcx + phw
    p_y1, p_y2 = pcy - phh, pcy + phh
    t_x1, t_x2 = tcx - thw, tcx + thw
    t_y1, t_y2 = tcy - thh, tcy + thh

    tl_x = jnp.maximum(p_x1, t_x1)
    tl_y = jnp.maximum(p_y1, t_y1)
    br_x = jnp.minimum(p_x2, t_x2)
    br_y = jnp.minimum(p_y2, t_y2)

    area_p = pw * ph
    area_g = tw * th

    en = ((tl_x < br_x) & (tl_y < br_y)).astype(pcx.dtype)
    area_i = (br_x - tl_x) * (br_y - tl_y) * en
    area_u = area_p + area_g - area_i
    # Exact divide: HBM-bound on v5e/v6e, hides under DMA; keeps accuracy.
    iou = area_i / (area_u + 1e-16)

    if loss_type == "iou":
        loss = 1.0 - iou * iou
    elif loss_type == "giou":
        c_w = jnp.maximum(p_x2, t_x2) - jnp.minimum(p_x1, t_x1)
        c_h = jnp.maximum(p_y2, t_y2) - jnp.minimum(p_y1, t_y1)
        area_c = c_w * c_h
        giou = iou - (area_c - area_u) / jnp.maximum(area_c, 1e-16)
        loss = 1.0 - jnp.clip(giou, -1.0, 1.0)
    else:
        raise ValueError(f"unknown loss_type {loss_type}")
    return loss


def _iou_loss_dense_kernel(p_ref, t_ref, out_ref, *, loss_type):
    # out_ref: (block_rows, 128) -> fully lane+sublane-dense stores.
    out_ref[...] = _compute_loss(p_ref, t_ref, loss_type)


def _iou_loss_psum_kernel(p_ref, t_ref, out_ref, *, loss_type, block_rows, n):
    """Per-block (8, 128) partial sums; pad mask only in the last block."""
    loss = _compute_loss(p_ref, t_ref, loss_type)
    i = pl.program_id(0)
    last = pl.num_programs(0) - 1

    def _fold(x):
        return x.reshape(block_rows // _SUBLANES, _SUBLANES, _LANES).sum(axis=0)

    @pl.when(i != last)
    def _():
        out_ref[...] = _fold(loss)

    @pl.when(i == last)
    def _():
        r = lax.broadcasted_iota(jnp.int32, (block_rows, _LANES), 0)
        l = lax.broadcasted_iota(jnp.int32, (block_rows, _LANES), 1)
        rem = n - i * (block_rows * _LANES)          # scalar RHS, local index LHS
        masked = jnp.where(r * _LANES + l < rem, loss, 0.0)
        out_ref[...] = _fold(masked)


def _iou_loss_scalar_kernel(p_ref, t_ref, out_ref, *, loss_type, block_rows,
                            n, mean):
    """Single-block path: full reduction in-kernel, scalar SMEM output."""
    loss = _compute_loss(p_ref, t_ref, loss_type)
    r = lax.broadcasted_iota(jnp.int32, (block_rows, _LANES), 0)
    l = lax.broadcasted_iota(jnp.int32, (block_rows, _LANES), 1)
    masked = jnp.where(r * _LANES + l < n, loss, 0.0)
    total = jnp.sum(masked)                  # XLU cross-lane reduce (free slot)
    if mean:
        total = total * (1.0 / n)
    out_ref[0, 0] = total


def _choose_tiling(n):
    rows = max(1, pl.cdiv(n, _LANES))
    if rows <= _SINGLE_BLOCK_MAX_ROWS:
        # Small/typical YOLOX sizes: one grid step (latency dominated).
        block_rows = _round_up(rows, _SUBLANES)
        num_blocks = 1
    else:
        # >= 2 blocks so the "parallel" axis can shard across v7x's two TCs;
        # block_rows adapted so tail padding stays a small fraction of a block
        # instead of rounding n_rows up to a full 1024-row block.
        num_blocks = max(2, pl.cdiv(rows, _MAX_BLOCK_ROWS))
        block_rows = min(_MAX_BLOCK_ROWS,
                         _round_up(pl.cdiv(rows, num_blocks), _SUBLANES))
        num_blocks = pl.cdiv(rows, block_rows)
    return num_blocks, block_rows


def _to_planes(x, n, n_rows):
    # (N, 4) -> (4, n_rows, 128) per-field planes, zero-padded.
    n_pad = n_rows * _LANES
    x = jnp.pad(x, ((0, n_pad - n), (0, 0)))
    return x.T.reshape(4, n_rows, _LANES)


def iou_loss(pred, target, *, reduction="none", loss_type="iou"):
    """JAX/Pallas equivalent of YOLOX IOUloss.forward."""
    assert pred.shape[0] == target.shape[0]
    pred = pred.reshape(-1, 4).astype(jnp.float32)
    target = target.reshape(-1, 4).astype(jnp.float32)
    n = pred.shape[0]

    if reduction not in ("none", "mean", "sum"):
        raise ValueError(f"unknown reduction {reduction}")

    if n == 0:
        # Match PyTorch on empty input: none -> empty, sum -> 0, mean -> NaN.
        if reduction == "none":
            return jnp.zeros((0,), jnp.float32)
        return jnp.float32(jnp.nan) if reduction == "mean" else jnp.float32(0.0)

    num_blocks, block_rows = _choose_tiling(n)
    n_rows = num_blocks * block_rows
    n_pad = n_rows * _LANES

    # TODO(synk): in a real training graph, emit pred/target directly as
    # (4, rows, 128) planes upstream so this pad+transpose (an extra HBM
    # round trip if XLA does not fuse it into the input DMA) disappears.
    pred_planes = _to_planes(pred, n, n_rows)
    tgt_planes = _to_planes(target, n, n_rows)

    in_specs = [
        pl.BlockSpec((4, block_rows, _LANES), lambda i: (0, i, 0)),
        pl.BlockSpec((4, block_rows, _LANES), lambda i: (0, i, 0)),
    ]
    cparams = pltpu.CompilerParams(
        dimension_semantics=("parallel",),
        allow_input_fusion=[True, True],
    )

    if reduction == "none":
        kernel = functools.partial(_iou_loss_dense_kernel, loss_type=loss_type)
        out = pl.pallas_call(
            kernel,
            out_shape=jax.ShapeDtypeStruct((n_rows, _LANES), jnp.float32),
            grid=(num_blocks,),
            in_specs=in_specs,
            out_specs=pl.BlockSpec((block_rows, _LANES), lambda i: (i, 0)),
            compiler_params=cparams,
        )(pred_planes, tgt_planes)
        return out.reshape(n_pad)[:n]

    if num_blocks == 1:
        # Small-N fast path: finish the reduction inside the kernel and emit a
        # single SMEM scalar (no extra XLA reduce op / HBM round trip).
        kernel = functools.partial(
            _iou_loss_scalar_kernel, loss_type=loss_type,
            block_rows=block_rows, n=n, mean=(reduction == "mean"))
        out = pl.pallas_call(
            kernel,
            out_shape=jax.ShapeDtypeStruct((1, 1), jnp.float32),
            grid=(1,),
            in_specs=in_specs,
            out_specs=pl.BlockSpec(memory_space=pltpu.MemorySpace.SMEM),
            compiler_params=pltpu.CompilerParams(
                dimension_semantics=("arbitrary",),
                allow_input_fusion=[True, True]),
        )(pred_planes, tgt_planes)
        return out[0, 0]

    # Large-N fused reduction: per-block masked partial sums (mask only in the
    # last block), tiny finish in plain JAX.
    kernel = functools.partial(_iou_loss_psum_kernel, loss_type=loss_type,
                               block_rows=block_rows, n=n)
    psums = pl.pallas_call(
        kernel,
        out_shape=jax.ShapeDtypeStruct((num_blocks * _SUBLANES, _LANES),
                                       jnp.float32),
        grid=(num_blocks,),
        in_specs=in_specs,
        out_specs=pl.BlockSpec((_SUBLANES, _LANES), lambda i: (i, 0)),
        compiler_params=cparams,
    )(pred_planes, tgt_planes)
    total = psums.sum()
    if reduction == "mean":
        return total / jnp.float32(n)
    return total


def _iou_loss_ref(pred, target, reduction="none", loss_type="iou"):
    # Pure-JAX reference mirroring the PyTorch module, for validation.
    pred = pred.reshape(-1, 4).astype(jnp.float32)
    target = target.reshape(-1, 4).astype(jnp.float32)
    tl = jnp.maximum(pred[:, :2] - pred[:, 2:] / 2, target[:, :2] - target[:, 2:] / 2)
    br = jnp.minimum(pred[:, :2] + pred[:, 2:] / 2, target[:, :2] + target[:, 2:] / 2)
    area_p = jnp.prod(pred[:, 2:], 1)
    area_g = jnp.prod(target[:, 2:], 1)
    en = jnp.prod((tl < br).astype(tl.dtype), axis=1)
    area_i = jnp.prod(br - tl, 1) * en
    area_u = area_p + area_g - area_i
    iou = area_i / (area_u + 1e-16)
    if loss_type == "iou":
        loss = 1 - iou ** 2
    else:
        c_tl = jnp.minimum(pred[:, :2] - pred[:, 2:] / 2, target[:, :2] - target[:, 2:] / 2)
        c_br = jnp.maximum(pred[:, :2] + pred[:, 2:] / 2, target[:, :2] + target[:, 2:] / 2)
        area_c = jnp.prod(c_br - c_tl, 1)
        giou = iou - (area_c - area_u) / jnp.maximum(area_c, 1e-16)
        loss = 1 - jnp.clip(giou, -1.0, 1.0)
    if reduction == "mean":
        loss = loss.mean()
    elif reduction == "sum":
        loss = loss.sum()
    return loss


if __name__ == "__main__":
    key = jax.random.PRNGKey(0)
    k1, k2, k3, k4 = jax.random.split(key, 4)

    ok = True
    # Small YOLOX-like matched-anchor counts; 300 exercises the pad mask.
    for n_boxes in (16, 300):
        pred = jnp.concatenate(
            [jax.random.uniform(k1, (n_boxes, 2)) * 32.0,
             jax.random.uniform(k2, (n_boxes, 2)) * 8.0 + 1.0], axis=1)
        target = jnp.concatenate(
            [jax.random.uniform(k3, (n_boxes, 2)) * 32.0,
             jax.random.uniform(k4, (n_boxes, 2)) * 8.0 + 1.0], axis=1)

        for loss_type in ("iou", "giou"):
            for reduction in ("none", "mean", "sum"):
                out = iou_loss(pred, target, reduction=reduction,
                               loss_type=loss_type)
                out = jax.block_until_ready(out)
                ref = _iou_loss_ref(pred, target, reduction=reduction,
                                    loss_type=loss_type)
                if not jnp.allclose(out, ref, rtol=1e-4, atol=1e-5):
                    ok = False

    print("KERNEL_OK" if ok else "KERNEL_MISMATCH")
</pallas_src>

<mosaic_0001>
module attributes {stable_mosaic.version = 11 : i64} {
  func.func @_iou_loss_dense_kernel(%arg0: i32, %arg1: memref<4x8x128xf32, #tpu.memory_space<vmem>>, %arg2: memref<4x8x128xf32, #tpu.memory_space<vmem>>, %arg3: memref<8x128xf32, #tpu.memory_space<vmem>>) attributes {dimension_semantics = [#tpu.dimension_semantics<parallel>], iteration_bounds = array<i64: 1>, scalar_prefetch = 0 : i64, scratch_operands = 0 : i64, tpu.core_type = #tpu.core_type<tc>, window_params = [{transform_indices = @transform_0, window_bounds = array<i64: 4, 8, 128>}, {transform_indices = @transform_1, window_bounds = array<i64: 4, 8, 128>}, {transform_indices = @transform_2, window_bounds = array<i64: 8, 128>}]} {
    %c0 = arith.constant 0 : index
    %c0_0 = arith.constant 0 : index
    %c0_1 = arith.constant 0 : index
    %0 = vector.load %arg1[%c0, %c0_0, %c0_1] : memref<4x8x128xf32, #tpu.memory_space<vmem>>, vector<1x8x128xf32>
    %1 = vector.shape_cast %0 : vector<1x8x128xf32> to vector<8x128xf32>
    %c1 = arith.constant 1 : index
    %c0_2 = arith.constant 0 : index
    %c0_3 = arith.constant 0 : index
    %2 = vector.load %arg1[%c1, %c0_2, %c0_3] : memref<4x8x128xf32, #tpu.memory_space<vmem>>, vector<1x8x128xf32>
    %3 = vector.shape_cast %2 : vector<1x8x128xf32> to vector<8x128xf32>
    %c2 = arith.constant 2 : index
    %c0_4 = arith.constant 0 : index
    %c0_5 = arith.constant 0 : index
    %4 = vector.load %arg1[%c2, %c0_4, %c0_5] : memref<4x8x128xf32, #tpu.memory_space<vmem>>, vector<1x8x128xf32>
    %5 = vector.shape_cast %4 : vector<1x8x128xf32> to vector<8x128xf32>
    %c3 = arith.constant 3 : index
    %c0_6 = arith.constant 0 : index
    %c0_7 = arith.constant 0 : index
    %6 = vector.load %arg1[%c3, %c0_6, %c0_7] : memref<4x8x128xf32, #tpu.memory_space<vmem>>, vector<1x8x128xf32>
    %7 = vector.shape_cast %6 : vector<1x8x128xf32> to vector<8x128xf32>
    %c0_8 = arith.constant 0 : index
    %c0_9 = arith.constant 0 : index
    %c0_10 = arith.constant 0 : index
    %8 = vector.load %arg2[%c0_8, %c0_9, %c0_10] : memref<4x8x128xf32, #tpu.memory_space<vmem>>, vector<1x8x128xf32>
    %9 = vector.shape_cast %8 : vector<1x8x128xf32> to vector<8x128xf32>
    %c1_11 = arith.constant 1 : index
    %c0_12 = arith.constant 0 : index
    %c0_13 = arith.constant 0 : index
    %10 = vector.load %arg2[%c1_11, %c0_12, %c0_13] : memref<4x8x128xf32, #tpu.memory_space<vmem>>, vector<1x8x128xf32>
    %11 = vector.shape_cast %10 : vector<1x8x128xf32> to vector<8x128xf32>
    %c2_14 = arith.constant 2 : index
    %c0_15 = arith.constant 0 : index
    %c0_16 = arith.constant 0 : index
    %12 = vector.load %arg2[%c2_14, %c0_15, %c0_16] : memref<4x8x128xf32, #tpu.memory_space<vmem>>, vector<1x8x128xf32>
    %13 = vector.shape_cast %12 : vector<1x8x128xf32> to vector<8x128xf32>
    %c3_17 = arith.constant 3 : index
    %c0_18 = arith.constant 0 : index
    %c0_19 = arith.constant 0 : index
    %14 = vector.load %arg2[%c3_17, %c0_18, %c0_19] : memref<4x8x128xf32, #tpu.memory_space<vmem>>, vector<1x8x128xf32>
    %15 = vector.shape_cast %14 : vector<1x8x128xf32> to vector<8x128xf32>
    %cst = arith.constant 5.000000e-01 : f32
    %16 = vector.broadcast %cst : f32 to vector<8x128xf32>
    %17 = arith.mulf %5, %16 : vector<8x128xf32>
    %cst_20 = arith.constant 5.000000e-01 : f32
    %18 = vector.broadcast %cst_20 : f32 to vector<8x128xf32>
    %19 = arith.mulf %7, %18 : vector<8x128xf32>
    %cst_21 = arith.constant 5.000000e-01 : f32
    %20 = vector.broadcast %cst_21 : f32 to vector<8x128xf32>
    %21 = arith.mulf %13, %20 : vector<8x128xf32>
    %cst_22 = arith.constant 5.000000e-01 : f32
    %22 = vector.broadcast %cst_22 : f32 to vector<8x128xf32>
    %23 = arith.mulf %15, %22 : vector<8x128xf32>
    %24 = arith.subf %1, %17 : vector<8x128xf32>
    %25 = arith.addf %1, %17 : vector<8x128xf32>
    %26 = arith.subf %3, %19 : vector<8x128xf32>
    %27 = arith.addf %3, %19 : vector<8x128xf32>
    %28 = arith.subf %9, %21 : vector<8x128xf32>
    %29 = arith.addf %9, %21 : vector<8x128xf32>
    %30 = arith.subf %11, %23 : vector<8x128xf32>
    %31 = arith.addf %11, %23 : vector<8x128xf32>
    %32 = arith.maximumf %24, %28 : vector<8x128xf32>
    %33 = arith.maximumf %26, %30 : vector<8x128xf32>
    %34 = arith.minimumf %25, %29 : vector<8x128xf32>
    %35 = arith.minimumf %27, %31 : vector<8x128xf32>
    %36 = arith.mulf %5, %7 : vector<8x128xf32>
    %37 = arith.mulf %13, %15 : vector<8x128xf32>
    %38 = arith.cmpf olt, %32, %34 : vector<8x128xf32>
    %39 = arith.cmpf olt, %33, %35 : vector<8x128xf32>
    %40 = arith.andi %38, %39 : vector<8x128xi1>
    %41 = arith.extui %40 : vector<8x128xi1> to vector<8x128xi32>
    %42 = arith.sitofp %41 : vector<8x128xi32> to vector<8x128xf32>
    %43 = arith.subf %34, %32 : vector<8x128xf32>
    %44 = arith.subf %35, %33 : vector<8x128xf32>
    %45 = arith.mulf %43, %44 : vector<8x128xf32>
    %46 = arith.mulf %45, %42 : vector<8x128xf32>
    %47 = arith.addf %36, %37 : vector<8x128xf32>
    %48 = arith.subf %47, %46 : vector<8x128xf32>
    %cst_23 = arith.constant 1.000000e-16 : f32
    %49 = vector.broadcast %cst_23 : f32 to vector<8x128xf32>
    %50 = arith.addf %48, %49 : vector<8x128xf32>
    %51 = arith.divf %46, %50 : vector<8x128xf32>
    %52 = arith.mulf %51, %51 : vector<8x128xf32>
    %cst_24 = arith.constant 1.000000e+00 : f32
    %53 = vector.broadcast %cst_24 : f32 to vector<8x128xf32>
    %54 = arith.subf %53, %52 : vector<8x128xf32>
    %c0_25 = arith.constant 0 : index
    %c0_26 = arith.constant 0 : index
    %55 = vector.load %arg3[%c0_25, %c0_26] : memref<8x128xf32, #tpu.memory_space<vmem>>, vector<8x128xf32>
    tpu.vector_store %arg3[%c0_25, %c0_26], %54 {strides = array<i32>} : memref<8x128xf32, #tpu.memory_space<vmem>>, vector<8x128xf32>,
    return
  }
  func.func @transform_0(%arg0: i32) -> (i32, i32, i32) {
    %c0_i32 = arith.constant 0 : i32
    %c0_i32_0 = arith.constant 0 : i32
    %c0_i32_1 = arith.constant 0 : i32
    return %c0_i32, %arg0, %c0_i32_0 : i32, i32, i32
  }
  func.func @transform_1(%arg0: i32) -> (i32, i32, i32) {
    %c0_i32 = arith.constant 0 : i32
    %c0_i32_0 = arith.constant 0 : i32
    %c0_i32_1 = arith.constant 0 : i32
    return %c0_i32, %arg0, %c0_i32_0 : i32, i32, i32
  }
  func.func @transform_2(%arg0: i32) -> (i32, i32) {
    %c0_i32 = arith.constant 0 : i32
    %c0_i32_0 = arith.constant 0 : i32
    return %arg0, %c0_i32 : i32, i32
  }
}

</mosaic_0001>

<bundles_post_ra>
// kernel: tpu_custom_call.1
= control target key start
LH: loop header
LB: loop body
LE: loop exit
PB: predicated region body
PF: predicated region fallthrough
CT: control target
= control target key end

     0   :  { %7 = vsyncpa [#allocation3], 0  ;;  %s241_s0 = inlined_call_operand.hbm [shape: f32[4,8,128], index: 0, kind: input, shape index: {}]   ;;  %s242_s1 = inlined_call_operand.hbm [shape: f32[4,8,128], index: 1, kind: input, shape index: {}]   ;;  %s243_s2 = inlined_call_operand.hbm [shape: f32[8,128], index: 2, kind: output, shape index: {}]  }
   0x1   :  { %8 = vsyncpa [#allocation6], 0 }
   0x2   :  { %9 = vsyncpa [#allocation4], 0  ;;  %s14_s11 = sshll.u32 %s241_s0, 4  ;;  %s211_s12 = smov [#allocation2]   ;;  %s15_s11 = int_to_ptr.hbm [resolvable:$true] %s14_s11 }
   0x3   :  { %s16_s13 = sshll.u32 %s211_s12, 4  ;;  %s27_s16 = sshll.u32 %s242_s1, 4  ;;  %s17_s13 = int_to_ptr.vmem [resolvable:$true] %s16_s13  ;;  %s28_s16 = int_to_ptr.hbm [resolvable:$true] %s27_s16 }
   0x4   :  { %s212_s17 = smov 128   ;;  %s213_s18 = smov 8  }
   0x5   :  { %22 = dma.hbm_to_vmem [thread:$0]  %s15_s11, 512, %s17_s13, [#allocation3], %s212_s17, %s212_s17, %s213_s18  }
   0x6   :  { %s214_s19 = smov [#allocation5]  }
   0x7   :  { %s29_s20 = sshll.u32 %s214_s19, 4  ;;  %s30_s20 = int_to_ptr.vmem [resolvable:$true] %s29_s20 }
   0x8   :  { %35 = dma.hbm_to_vmem [thread:$0]  %s28_s16, 512, %s30_s20, [#allocation6], %s212_s17, %s212_s17, %s213_s18  }
   0x9   :  { %205 = dma.done.wait [#allocation3], 512  }
   0xa   :  { %206 = vsyncadd [#allocation3], 4294966784 }
   0xb   :  { %207 = dma.done.wait [#allocation6], 512  }
   0xc   :  { %208 = vsyncadd [#allocation6], 4294966784  ;;  %v44_v0 = vld [vmem:[#allocation2] sm:$0xff]  ;;  %v48_v1 = vld [vmem:[#allocation2 + $0x10] sm:$0xff]  ;;  %v215_v28 = vmov 0.0   ;;  %s216_s0 = smov [#allocation7]  }
   0xd   :  { %v46_v2 = vld [vmem:[#allocation2 + $0x8] sm:$0xff]  ;;  %v50_v3 = vld [vmem:[#allocation2 + $0x18] sm:$0xff]  ;;  %v51_v4 = vld [vmem:[#allocation5] sm:$0xff]  ;;  %v58_v5 = vmul.f32 0.5, %v48_v1  ;;  %s111_s1 = sshll.u32 %s216_s0, 4  ;;  %s113_s23 = sshll.u32 %s243_s2, 4  ;;  %s112_s1 = int_to_ptr.vmem [resolvable:$true] %s111_s1  ;;  %s114_s23 = int_to_ptr.hbm [resolvable:$true] %s113_s23 }
   0xe   :  { %v53_v6 = vld [vmem:[#allocation5 + $0x8] sm:$0xff]  ;;  %v55_v7 = vld [vmem:[#allocation5 + $0x10] sm:$0xff]  ;;  %v57_v8 = vld [vmem:[#allocation5 + $0x18] sm:$0xff]  ;;  %v59_v9 = vmul.f32 0.5, %v50_v3  ;;  %v74_v20 = vmul.f32 %v50_v3, %v48_v1 }
   0xf   :  { %v60_v10 = vmul.f32 0.5, %v55_v7  ;;  %v61_v11 = vmul.f32 0.5, %v57_v8  ;;  %v62_v12 = vsub.f32 %v44_v0, %v58_v5  ;;  %v63_v13 = vadd.f32 %v58_v5, %v44_v0 }
  0x10   :  { %v64_v14 = vsub.f32 %v46_v2, %v59_v9  ;;  %v65_v15 = vadd.f32 %v59_v9, %v46_v2  ;;  %v75_v21 = vmul.f32 %v57_v8, %v55_v7 }
  0x11   :  { %v66_v16 = vsub.f32 %v51_v4, %v60_v10  ;;  %v67_v17 = vadd.f32 %v60_v10, %v51_v4  ;;  %v68_v18 = vsub.f32 %v53_v6, %v61_v11  ;;  %v69_v19 = vadd.f32 %v61_v11, %v53_v6 }
  0x12   :  { %v85_v31 = vadd.f32 %v75_v21, %v74_v20 }
  0x13   :  { %v70_v22 = vmax.f32 %v62_v12, %v66_v16  ;;  %v71_v23 = vmax.f32 %v64_v14, %v68_v18  ;;  %v72_v24 = vmin.f32 %v63_v13, %v67_v17  ;;  %v73_v25 = vmin.f32 %v65_v15, %v69_v19 }
  0x15   :  { %vm76_vm0 = vcmp.lt.f32.partialorder %v70_v22, %v72_v24  ;;  %vm77_vm1 = vcmp.lt.f32.partialorder %v71_v23, %v73_v25  ;;  %v81_v26 = vsub.f32 %v72_v24, %v70_v22  ;;  %v82_v27 = vsub.f32 %v73_v25, %v71_v23 }
  0x16   :  { %vm78_vm2 = vmand %vm76_vm0, %vm77_vm1 }
  0x17   :  { %v124_v29 = vsel %vm78_vm2, 1.0, %v215_v28  ;;  %v83_v30 = vmul.f32 %v82_v27, %v81_v26 }
  0x19   :  { %v84_v32 = vmul.f32 %v124_v29, %v83_v30 }
  0x1b   :  { %v86_v33 = vsub.f32 %v85_v31, %v84_v32 }
  0x1d   :  { %v87_v34 = vadd.f32 1e-16, %v86_v33 }
  0x1f   :  { %131 = vrcp.f32 %v87_v34  ;;  %v99_v37 = vand.u32 2147483648, %v87_v34  ;;  %vm93_vm3 = vweird.f32 %v87_v34  ;;  %v97_v39 = vand.u32 2147483647, %v87_v34 }
  0x21   :  { %v100_v41 = vor.u32 1.1754944e-38, %v99_v37  ;;  %vm98_vm6 = vcmp.eq.f32.partialorder %v97_v39, 8.507059e+37 }
  0x25   :  { %v132_v35 = vpop.eup %131 }
  0x26   :  { %v89_v36 = vmul.f32 %v132_v35, %v87_v34  ;;  %vm94_vm4 = vweird.f32 %v132_v35 }
  0x27   :  { %vm95_vm5 = vmor %vm93_vm3, %vm94_vm4 }
  0x28   :  { %v90_v38 = vsub.f32 1.0, %v89_v36 }
  0x2a   :  { %v91_v40 = vmul.f32 %v132_v35, %v90_v38 }
  0x2c   :  { %v92_v42 = vadd.f32 %v132_v35, %v91_v40 }
  0x2e   :  { %v96_v43 = vsel %vm95_vm5, %v132_v35, %v92_v42 }
  0x2f   :  { %v101_v44 = vsel %vm98_vm6, %v100_v41, %v96_v43 }
  0x30   :  { %v102_v45 = vmul.f32 %v101_v44, %v84_v32 }
  0x32   :  { %v103_v46 = vmul.f32 %v102_v45, %v102_v45 }
  0x34   :  { %v104_v47 = vsub.f32 1.0, %v103_v46 }
  0x36   :  { %105 = vst [vmem:[#allocation7] sm:$0xff] %v104_v47 }
  0x37   :  { %116 = dma.vmem_to_hbm [thread:$0]  %s112_s1, 128, %s114_s23, [#allocation4]  }
  0x38   :  { %209 = dma.done.wait [#allocation4], 128  }
  0x39   :  { %210 = vsyncadd [#allocation4], 4294967168 }
  0x3a   :  { %121 = vsyncpa [#allocation3], 1 }
  0x3b   :  { %122 = vsyncpa [#allocation6], 1 }
  0x3c   :  { %123 = vsyncpa [#allocation4], 1 }

</bundles_post_ra>
